<compile_context>
chip_gen: v7x
topology: tpu7x:2x2x1
jax: 0.10.0
libtpu: 0.0.40
codegen_flags: <defaults>
</compile_context>

<pallas_src>
import functools

import jax
import jax.numpy as jnp
from jax.experimental import pallas as pl
from jax.experimental.pallas import tpu as pltpu

# VMEM budget used both for tile sizing and as the scoped limit we request.
# 32 MiB is safe on every generation (v5e/v6e: 128 MiB physical, v7x: 64 MiB).
_VMEM_BUDGET_BYTES = 32 * 1024 * 1024


def _conv_bn_act_kernel(w_ref, x_ref, shift_ref, o_ref, *, apply_relu):
    """One fused tile: [Cout, K] @ [K, TILE_M]  + folded-BN shift (+ ReLU)."""
    acc = jnp.dot(w_ref[...], x_ref[...], preferred_element_type=jnp.float32)
    y = acc + shift_ref[...]              # [Cout, 1] broadcast along lanes
    if apply_relu:
        y = jnp.maximum(y, 0.0)
    o_ref[...] = y.astype(o_ref.dtype)


def _pick_tile_m(m, k_taps, cout, itemsize, vmem_budget=_VMEM_BUDGET_BYTES):
    """Largest lane tile (multiple of 128) whose double-buffered in+out tiles fit."""
    per_col = 2 * itemsize * (k_taps + cout)       # x2: double buffering
    t = (vmem_budget // 2) // per_col              # keep half the budget as headroom
    t = max(128, (t // 128) * 128)
    t = min(t, 4096)                               # keep per-step DMA latency sane
    m_ceil = -(-m // 128) * 128
    return min(t, m_ceil)


def conv_bn_layer(x_nchw, weight_oihw, gamma, beta, running_mean, running_var,
                  *, stride=1, padding=1, eps=1e-5, if_act=True, act="relu",
                  tile_m=None, compute_dtype=jnp.float32):
    """ConvBNLayer forward (groups=1). Input/output are NCHW like PyTorch."""
    N, Cin, H, W = x_nchw.shape
    Cout, Cin_w, KH, KW = weight_oihw.shape
    if Cin_w != Cin:
        # TODO(synk): grouped / depthwise convolution (groups > 1) not implemented.
        raise NotImplementedError("only groups=1 is supported")
    if if_act and act not in ("relu",):
        # TODO(synk): other Activation() types (hardswish, ...) not ported.
        raise NotImplementedError(f"activation {act!r} not supported")

    Ho = (H + 2 * padding - KH) // stride + 1
    Wo = (W + 2 * padding - KW) // stride + 1
    M = N * Ho * Wo
    K_taps = KH * KW * Cin

    # ---- glue: BatchNorm (eval) folding + weight relayout --------------------
    inv_std = jax.lax.rsqrt(running_var.astype(jnp.float32) + eps)
    scale = gamma.astype(jnp.float32) * inv_std                             # [Cout]
    shift = (beta.astype(jnp.float32)
             - running_mean.astype(jnp.float32) * scale).reshape(Cout, 1)

    # OIHW -> [Cout, (kh, kw, cin)], with the BN scale folded into the weights.
    w2 = jnp.transpose(weight_oihw.astype(jnp.float32), (0, 2, 3, 1))       # [Cout,KH,KW,Cin]
    w2 = (w2.reshape(Cout, K_taps) * scale[:, None]).astype(compute_dtype)

    # ---- glue: im2col in channel-major / lane-dense layout --------------------
    # Xcol[(kh, kw, cin), (n, ho, wo)] : spatial M sits in the lane axis.
    x_pad = jnp.pad(x_nchw, ((0, 0), (0, 0), (padding, padding), (padding, padding)))
    taps = []
    for kh in range(KH):
        for kw in range(KW):
            taps.append(
                x_pad[:, :, kh:kh + (Ho - 1) * stride + 1:stride,
                            kw:kw + (Wo - 1) * stride + 1:stride])          # [N,Cin,Ho,Wo]
    x_col = jnp.stack(taps, axis=0).reshape(KH, KW, N, Cin, Ho, Wo)
    x_col = x_col.transpose(0, 1, 3, 2, 4, 5).reshape(K_taps, M)            # (kh,kw,cin) x (n,ho,wo)
    x_col = x_col.astype(compute_dtype)

    # ---- tiling over the (parallel) flattened-spatial axis --------------------
    itemsize = jnp.dtype(compute_dtype).itemsize
    TILE_M = tile_m if tile_m is not None else _pick_tile_m(M, K_taps, Cout, itemsize)
    M_pad = pl.cdiv(M, TILE_M) * TILE_M
    if M_pad != M:
        x_col = jnp.pad(x_col, ((0, 0), (0, M_pad - M)))

    out = pl.pallas_call(
        functools.partial(_conv_bn_act_kernel, apply_relu=bool(if_act)),
        out_shape=jax.ShapeDtypeStruct((Cout, M_pad), x_nchw.dtype),
        grid_spec=pltpu.PrefetchScalarGridSpec(
            num_scalar_prefetch=0,
            grid=(M_pad // TILE_M,),
            in_specs=[
                pl.BlockSpec((Cout, K_taps), lambda i: (0, 0)),    # weights (resident)
                pl.BlockSpec((K_taps, TILE_M), lambda i: (0, i)),  # patch tile (pipelined)
                pl.BlockSpec((Cout, 1), lambda i: (0, 0)),         # BN shift (resident)
            ],
            out_specs=pl.BlockSpec((Cout, TILE_M), lambda i: (0, i)),
        ),
        compiler_params=pltpu.CompilerParams(
            dimension_semantics=("parallel",),
            vmem_limit_bytes=_VMEM_BUDGET_BYTES,
        ),
    )(w2, x_col, shift)

    # Output is already channel-major: one cheap transpose back to NCHW.
    out = out[:, :M].reshape(Cout, N, Ho, Wo)
    return jnp.transpose(out, (1, 0, 2, 3))


def _reference(x_nchw, weight_oihw, gamma, beta, running_mean, running_var,
               *, stride=1, padding=1, eps=1e-5):
    y = jax.lax.conv_general_dilated(
        x_nchw.astype(jnp.float32), weight_oihw.astype(jnp.float32),
        window_strides=(stride, stride),
        padding=[(padding, padding), (padding, padding)],
        dimension_numbers=("NCHW", "OIHW", "NCHW"))
    inv_std = jax.lax.rsqrt(running_var + eps)
    y = (y - running_mean[None, :, None, None]) * inv_std[None, :, None, None]
    y = y * gamma[None, :, None, None] + beta[None, :, None, None]
    return jnp.maximum(y, 0.0)


if __name__ == "__main__":
    # ConvBNLayer(in_channels=4, out_channels=8, kernel_size=3, stride=1,
    #             padding=1, groups=1, if_act=True, act="relu")
    N, Cin, H, W = 2, 4, 16, 16
    Cout, K = 8, 3

    key = jax.random.PRNGKey(0)
    kx, kw, kg, kb, km, kv = jax.random.split(key, 6)

    x = jax.random.normal(kx, (N, Cin, H, W), dtype=jnp.float32)
    weight = jax.random.normal(kw, (Cout, Cin, K, K), dtype=jnp.float32) * 0.1
    gamma = 1.0 + 0.1 * jax.random.normal(kg, (Cout,), dtype=jnp.float32)
    beta = 0.1 * jax.random.normal(kb, (Cout,), dtype=jnp.float32)
    running_mean = 0.1 * jax.random.normal(km, (Cout,), dtype=jnp.float32)
    running_var = jnp.abs(jax.random.normal(kv, (Cout,), dtype=jnp.float32)) + 0.5

    # tile_m=128 so the tiny demo shape still exercises a multi-step pipelined grid
    # (M = N*Ho*Wo = 512 -> grid of 4). In production leave tile_m=None (auto-size).
    out = conv_bn_layer(x, weight, gamma, beta, running_mean, running_var,
                        stride=1, padding=1, if_act=True, act="relu", tile_m=128)
    out = jax.block_until_ready(out)

    ref = _reference(x, weight, gamma, beta, running_mean, running_var,
                     stride=1, padding=1)
    assert out.shape == (N, Cout, H, W), out.shape
    assert jnp.allclose(out, ref, atol=2e-4, rtol=2e-4), \
        float(jnp.max(jnp.abs(out - ref)))

    print("KERNEL_OK")
</pallas_src>

<mosaic_0001>
module attributes {stable_mosaic.version = 11 : i64} {
  func.func @_conv_bn_act_kernel(%arg0: i32, %arg1: memref<8x36xf32, #tpu.memory_space<vmem>>, %arg2: memref<36x128xf32, #tpu.memory_space<vmem>>, %arg3: memref<8x1xf32, #tpu.memory_space<vmem>>, %arg4: memref<8x128xf32, #tpu.memory_space<vmem>>) attributes {dimension_semantics = [#tpu.dimension_semantics<parallel>], iteration_bounds = array<i64: 4>, scalar_prefetch = 0 : i64, scratch_operands = 0 : i64, tpu.core_type = #tpu.core_type<tc>, window_params = [{pipeline_mode = #tpu.pipeline_mode<synchronous>, transform_indices = @transform_0, window_bounds = array<i64: 8, 36>}, {transform_indices = @transform_1, window_bounds = array<i64: 36, 128>}, {pipeline_mode = #tpu.pipeline_mode<synchronous>, transform_indices = @transform_2, window_bounds = array<i64: 8, 1>}, {transform_indices = @transform_3, window_bounds = array<i64: 8, 128>}]} {
    %c0 = arith.constant 0 : index
    %c0_0 = arith.constant 0 : index
    %0 = vector.load %arg1[%c0, %c0_0] : memref<8x36xf32, #tpu.memory_space<vmem>>, vector<8x36xf32>
    %c0_1 = arith.constant 0 : index
    %c0_2 = arith.constant 0 : index
    %1 = vector.load %arg2[%c0_1, %c0_2] : memref<36x128xf32, #tpu.memory_space<vmem>>, vector<36x128xf32>
    %cst = arith.constant dense<0.000000e+00> : vector<8x128xf32>
    %2 = tpu.matmul %0, %1, %cst {dimension_numbers = #tpu.dot_dimension_numbers<[1], [0], [0], [1], [0, 0, 1, 1], [], []>} : vector<8x36xf32>, vector<36x128xf32>, vector<8x128xf32> -> vector<8x128xf32>
    %c0_3 = arith.constant 0 : index
    %c0_4 = arith.constant 0 : index
    %3 = vector.load %arg3[%c0_3, %c0_4] : memref<8x1xf32, #tpu.memory_space<vmem>>, vector<8x1xf32>
    %4 = vector.broadcast %3 : vector<8x1xf32> to vector<8x128xf32>
    %5 = arith.addf %2, %4 : vector<8x128xf32>
    %cst_5 = arith.constant 0.000000e+00 : f32
    %6 = vector.broadcast %cst_5 : f32 to vector<8x128xf32>
    %7 = arith.maximumf %5, %6 : vector<8x128xf32>
    %c0_6 = arith.constant 0 : index
    %c0_7 = arith.constant 0 : index
    %8 = vector.load %arg4[%c0_6, %c0_7] : memref<8x128xf32, #tpu.memory_space<vmem>>, vector<8x128xf32>
    tpu.vector_store %arg4[%c0_6, %c0_7], %7 {strides = array<i32>} : memref<8x128xf32, #tpu.memory_space<vmem>>, vector<8x128xf32>,
    return
  }
  func.func @transform_0(%arg0: i32) -> (i32, i32) {
    %c0_i32 = arith.constant 0 : i32
    %c0_i32_0 = arith.constant 0 : i32
    %c0_i32_1 = arith.constant 0 : i32
    return %c0_i32, %c0_i32_0 : i32, i32
  }
  func.func @transform_1(%arg0: i32) -> (i32, i32) {
    %c0_i32 = arith.constant 0 : i32
    %c0_i32_0 = arith.constant 0 : i32
    return %c0_i32, %arg0 : i32, i32
  }
  func.func @transform_2(%arg0: i32) -> (i32, i32) {
    %c0_i32 = arith.constant 0 : i32
    %c0_i32_0 = arith.constant 0 : i32
    %c0_i32_1 = arith.constant 0 : i32
    return %c0_i32, %c0_i32_0 : i32, i32
  }
  func.func @transform_3(%arg0: i32) -> (i32, i32) {
    %c0_i32 = arith.constant 0 : i32
    %c0_i32_0 = arith.constant 0 : i32
    return %c0_i32, %arg0 : i32, i32
  }
}

</mosaic_0001>

<bundles_post_ra>
// kernel: tpu_custom_call.1
= control target key start
LH: loop header
LB: loop body
LE: loop exit
PB: predicated region body
PF: predicated region fallthrough
CT: control target
= control target key end

     0   :  { %8 = vsyncpa [#allocation3], 0  ;;  %s745_s0 = inlined_call_operand.vmem [shape: f32[8,36], index: 0, kind: input, shape index: {}]   ;;  %s746_s1 = inlined_call_operand.hbm [shape: f32[36,512], index: 1, kind: input, shape index: {}]   ;;  %s747_s2 = inlined_call_operand.vmem [shape: f32[8,1], index: 2, kind: input, shape index: {}]   ;;  %s748_s3 = inlined_call_operand.hbm [shape: f32[8,512], index: 3, kind: output, shape index: {}]  }
   0x1   :  { %10 = vsyncpa [#allocation3 + $0x1], 0 }
   0x2   :  { %11 = vsyncpa [#allocation4], 0 }
   0x3   :  { %13 = vsyncpa [#allocation4 + $0x1], 0  ;;  %s584_s12 = smov 0   ;;  %s586_s13 = smov 0  }
   0x4   :  { %s588_s14 = smov 0   ;;  %s590_s15 = smov 0  }
   0x5 LB: > { %s605_s16 = sadd.s32 4294967295, %s553_s15   ;;  %s364_s17 = sadd.s32 4294967294, %s553_s15   ;;  %s553_s15 = sphi %s590_s15, %s760_s15   ;;  %s549_s14 = sphi %s588_s14, %s759_s14   ;;  %s545_s13 = sphi %s586_s13, %s758_s13   ;;  %s541_s12 = sphi %s584_s12, %s757_s12  }
   0x6   : > { %s609_s18 = sadd.s32 1, %s553_s15   ;;  %s47_s19 = sadd.s32 1, %s549_s14 }
   0x7   : > { %s44_s20 = ssub.s32 %s553_s15, %s609_s18  ;;  %p54_p0 = scmp.ne.s32.totalorder %s549_s14, %s545_s13 }
   0x8   : > { %p45_p1 = scmp.eq.s32.totalorder %s44_s20, 0  ;;  %p55_p2 = scmp.eq.s32.totalorder %s553_s15, 0 }
   0x9   : > { %p60_p3 = scmp.ne.s32.totalorder %s545_s13, %s541_s12  ;;  %p61_p4 = scmp.eq.s32.totalorder %s605_s16, 0 }
   0xa   : > { %s621_s21 = scalar_select %p45_p1, %s549_s14, %s47_s19  }
   0xb   : > { %p56_p5 = por %p55_p2, %p54_p0  ;;  %p623_p6 = por %p61_p4, %p60_p3 }
   0xc   : > { %p105_p7 = scmp.eq.s32.totalorder %s605_s16, 3  ;;  %p111_p8 = scmp.eq.s32.totalorder %s364_s17, 3 }
   0xd   : > { %p415_p9 = scmp.lt.s32.totalorder %s553_s15, 4  ;;  %s137_s25 = sand.u32 1, %s549_s14  }
   0xe   : > { %p629_p10 = por %p105_p7, %p54_p0  ;;  %p633_p11 = por %p111_p8, %p60_p3 }
   0xf   : > { %s367_s26 = sshll.u32 %s553_s15, 7  ;;  %s401_s27 = smul.u32 40, %s137_s25 }
  0x10   : > { %s751_s23 = scalar_select %p629_p10, 1, 0 }
  0x11   : > { %s752_s24 = scalar_select %p633_p11, 1, 0 }
  0x12   : > { %s642_s30 = scalar_lea.hbm %s746_s1, %s367_s26  ;;  %p644_p12 = pnand %p415_p9, %p56_p5 }
  0x13   : > { %s141_s5 = scalar_lea.vmem [#allocation2], %s401_s27  ;;  %s651_s7 = scalar_lea.sflag [#allocation3], %s137_s25 }
  0x14   : > { %s147_s6 = sshll.u32 %s141_s5, 4  ;;  %s457_s8 = scalar_lea.hbm %s642_s30, 640  ;;  %s648_s6 = int_to_ptr.vmem [resolvable:$true] %s147_s6 }
  0x15   : > { %p458_p0 = scmp.ne.s32.totalorder %s642_s30, %s457_s8  ;;  %p459_p1 = pneg %p644_p12 }
  0x16   : > { %s462_s11 = scalar_lea.hbm %s746_s1, 2560  ;;  %p463_p4 = scmp.lt.u32.totalorder %s642_s30, %s746_s1 }
  0x17   : > { %p460_p2 = pnand %p459_p1, %p458_p0  ;;  %p464_p5 = scmp.lt.u32.totalorder %s462_s11, %s457_s8 }
  0x18   : > { %p466_p8 = scmp.lt.u32.totalorder %s457_s8, %s642_s30 }
  0x19   : > { %p461_p3 = pneg %p460_p2  ;;  %p465_p7 = por %p464_p5, %p463_p4 }
  0x1b   : > { %p467_p9 = por %p466_p8, %p465_p7 }
  0x1d   : > { %p468_p13 = pnand %p467_p9, %p461_p3 }
  0x1f   : > { %471 = shalt.err (!%p468_p13)
}
  0x20   : > { %s472_s20 = scalar_lea.vmem %s648_s6, 640  ;;  %s555_s25 = smov [#allocation2]  }
  0x21   : > { %p473_p0 = scmp.ne.s32.totalorder %s648_s6, %s472_s20  ;;  %s477_s26 = sshll.u32 %s555_s25, 4  ;;  %s478_s26 = int_to_ptr.vmem [resolvable:$false] %s477_s26 }
  0x22   : > { %s479_s27 = scalar_lea.vmem %s478_s26, 1280  ;;  %p480_p10 = scmp.lt.s32.totalorder %s648_s6, %s478_s26 }
  0x23   : > { %p475_p2 = pnand %p473_p0, %p459_p1  ;;  %p481_p4 = scmp.lt.s32.totalorder %s479_s27, %s472_s20 }
  0x25   : > { %p476_p11 = pneg %p475_p2  ;;  %p482_p5 = por %p481_p4, %p480_p10 }
  0x27   : > { %p483_p7 = pnand %p482_p5, %p476_p11 }
  0x29   : > { %486 = shalt.err (!%p483_p7)
}
  0x2a   : > { %s556_s28 = smov 512   ;;  %s557_s29 = smov 128  }
  0x2b   : > { %s558_s5 = smov 8   ;;  %p155_p13 = scmp.lt.s32.totalorder %s553_s15, 5 }
  0x2c   : > { %410 = dma.hbm_to_vmem [thread:$0]  (!%p644_p12), %s642_s30, 640, %s648_s6, %s651_s7, %s556_s28, %s557_s29, %s558_s5  }
  0x2d   : > { %p754_p1 = scmp.ge.s32.totalorder %s553_s15, 1 }
  0x2f   : > { %p156_p3 = pnand %p754_p1, %p155_p13 }
  0x30   : > { %s683_s8 = sand.u32 (!%p156_p3), 1, %s545_s13  }
  0x31   : > { %159 = sbr.rel (%p156_p3) target bundleno = 300 (0x12c), region = 32  ;;  %s162_s10 = scalar_lea.sflag (!%p156_p3), [#allocation3], %s683_s8 }
  0x32   : > { %s402_s9 = smul.u32 (!%p156_p3), 40, %s683_s8 }
  0x34   : > { %s165_s11 = scalar_lea.vmem (!%p156_p3), [#allocation2], %s402_s9 }
  0x38   : > { %532 = dma.done.wait (%p623_p6), %s162_s10, 640  }
  0x39   : > { %534 = vsyncadd (%p623_p6), %s162_s10, 4294966656  ;;  %v559_v0 = vmov 0.0|0.0   ;;  %vm560_vm0 = vmmov 0   ;;  %v561_v1 = vmov 0.0   ;;  %v562_v2 = vmov 0   ;;  %v189_v3 = vld [vmem:[%s165_s11] sm:$0xff] }
  0x3a   : > { %395 = vmatprep.subr.bf16.mxu0 %v559_v0  ;;  %392 = vmatprep.mubr.msk.f32.mxu0 %vm560_vm0, %v561_v1  ;;  %v190_v4 = vld [vmem:[%s165_s11 + $0x8] sm:$0xff]  ;;  %v191_v5 = vld [vmem:[%s165_s11 + $0x10] sm:$0xff]  ;;  %v192_v7 = vld [vmem:[%s165_s11 + $0x18] sm:$0xff]  ;;  %vm204_vm1 = vcmask 1043456   ;;  %vm200_vm2 = vcmask 293888   ;;  %s369_s7 = sshll.u32 %s683_s8, 3 }
  0x3b   : > { %456 = vset.pattern.permute.xlu0 %v562_v2  ;;  %v396_v6 = vpack.c.bf16 %v190_v4, %v189_v3  ;;  %v194_v8 = vld [vmem:[%s747_s2] sm:$0xff]  ;;  %v399_v9 = vpack.c.bf16 %v192_v7, %v191_v5  ;;  %s373_s17 = sshll.u32 %s605_s16, 7  ;;  %s187_s19 = scalar_lea.vmem [#allocation5], %s369_s7 }
  0x3c   : > { %197 = vperm.xlu0 %456, %v194_v8   ;;  %v193_v10 = vld [vmem:[%s165_s11 + $0x20] sm:$0xf]  ;;  %s294_s20 = sshll.u32 %s187_s19, 4  ;;  %s702_s27 = scalar_lea.hbm %s748_s3, %s373_s17  ;;  %s704_s20 = int_to_ptr.vmem [resolvable:$true] %s294_s20 }
  0x3d   : > { %397 = vmatpush3.bf16.msra.mxu0 %v396_v6  ;;  %v188_v11 = vld [vmem:[%s745_s0] sm:$0xff]  ;;  %s281_s28 = scalar_lea.sflag [#allocation4], %s683_s8  ;;  %s487_s29 = scalar_lea.vmem %s704_s20, 128 }
  0x3e   : > { %398 = vmatprep.subr.bf16.mxu0 %v559_v0  ;;  %p488_p6 = scmp.ne.s32.totalorder %s704_s20, %s487_s29  ;;  %p755_p10 = scmp.ne.s32.totalorder %s751_s23, 0 }
  0x3f   : > { %s563_s16 = smov [#allocation5]  }
  0x40   : > { %p489_p11 = pnand %p488_p6, %p755_p10  ;;  %s491_s5 = sshll.u32 %s563_s16, 4  ;;  %s492_s5 = int_to_ptr.vmem [resolvable:$false] %s491_s5 }
  0x41   : > { %400 = vmatpush3.bf16.msra.mxu0 %v399_v9  ;;  %s493_s9 = scalar_lea.vmem %s492_s5, 256  ;;  %p494_p8 = scmp.lt.s32.totalorder %s704_s20, %s492_s5 }
  0x42   : > { %390 = vmatprep.subr.mxu0 %v561_v1  ;;  %p490_p12 = pneg %p489_p11  ;;  %p495_p9 = scmp.lt.s32.totalorder %s493_s9, %s487_s29 }
  0x44   : > { %p496_p0 = por %p495_p9, %p494_p8 }
  0x45   : > { %391 = vmatpush3.msk.msra.mxu0 %vm204_vm1, %v193_v10 }
  0x46   : > { %393 = vmatmul.mubr.msk.f32.vlgmr.msra.gmra.mrb[0].mxu0 %vm200_vm2, %v188_v11  ;;  %p497_p2 = pnand %p496_p0, %p490_p12 }
  0xbb   : > { %v198_v12 = vpop.permute.xlu0 %197 }
 0x119   : > { %v274_v13 = vpop.f32.mrb[0].mxu0 }
 0x11a   : > { %v275_v14 = vadd.f32 %v274_v13, %v198_v12  ;;  %v394_v15 = vpop.f32.mrb[1].mxu0 }
 0x11c   : > { %v278_v16 = vmax.f32 %v275_v14, 0.0 }
 0x11e   : > { %279 = vst [vmem:[%s187_s19] sm:$0xff] %v278_v16 }
 0x11f   : > { %500 = shalt.err (!%p497_p2)
}
 0x120   : > { %s501_s8 = scalar_lea.hbm %s702_s27, 128  ;;  %s505_s30 = scalar_lea.hbm %s748_s3, 512 }
 0x121   : > { %p502_p4 = scmp.ne.s32.totalorder %s702_s27, %s501_s8  ;;  %p506_p13 = scmp.lt.u32.totalorder %s702_s27, %s748_s3 }
 0x122   : > { %p507_p1 = scmp.lt.u32.totalorder %s505_s30, %s501_s8  ;;  %p509_p6 = scmp.lt.u32.totalorder %s501_s8, %s702_s27 }
 0x123   : > { %p503_p5 = pnand %p502_p4, %p755_p10 }
 0x124   : > { %p508_p3 = por %p507_p1, %p506_p13 }
 0x125   : > { %p504_p7 = pneg %p503_p5 }
 0x126   : > { %p510_p11 = por %p509_p6, %p508_p3 }
 0x128   : > { %p511_p12 = pnand %p510_p11, %p504_p7 }
 0x12a   : > { %514 = shalt.err (!%p511_p12)
}
 0x12b   : > { %405 = dma.vmem_to_hbm [thread:$0]  (%p755_p10), %s704_s20, 128, %s702_s27, %s281_s28  }
 0x12c PF: > { %p416_p8 = scmp.ge.s32.totalorder %s553_s15, 2  ;;  %s306_s6 = sand.u32 1, %s541_s12  }
 0x12d   : > { %p756_p9 = scmp.ne.s32.totalorder %s752_s24, 0  ;;  %s307_s7 = scalar_lea.sflag [#allocation4], %s306_s6 }
 0x12f   : > { %p412_p0 = pnand %p416_p8, %p756_p9 }
 0x131   : > { %536 = dma.done.wait (!%p412_p0), %s307_s7, 128  }
 0x132   : > { %538 = vsyncadd (!%p412_p0), %s307_s7, 4294967168  ;;  %p16_p2 = scmp.ge.s32.totalorder %s609_s18, 6   ;;  %s757_s12 = smov %s545_s13 }
 0x133   : > { %s758_s13 = smov %s549_s14  ;;  %s759_s14 = smov %s621_s21 }
 0x134   : > { %s760_s15 = smov %s609_s18  ;;  %18 = sbr.rel (!%p16_p2) target bundleno = 5 (0x5), region = 77 }
 0x13b   :  { %312 = vsyncpa [#allocation3], 1 }
 0x13c   :  { %314 = vsyncpa [#allocation3 + $0x1], 1 }
 0x13d   :  { %315 = vsyncpa [#allocation4], 1 }
 0x13e   :  { %317 = vsyncpa [#allocation4 + $0x1], 1 }

</bundles_post_ra>
